<compile_context>
chip_gen: v7x
topology: tpu7x:2x2x1
jax: 0.10.0
libtpu: 0.0.40
codegen_flags: <defaults>
</compile_context>

<pallas_src>
import functools

import jax
import jax.numpy as jnp
from jax import lax
from jax.experimental import pallas as pl
from jax.experimental.pallas import tpu as pltpu


_OUT_LANES = 128  # lane-dense packed output width (col 0 = top_dot, col 1 = lse)


def _skipgram_kernel(c_sm, o_sm, tbl_ref, out_ref, c_emb_ref, o_emb_ref, *,
                     matmul_dtype):
    i = pl.program_id(0)
    tb = out_ref.shape[0]

    # --- gather center / outside embedding rows via SMEM scalar indices
    #     (dynamic sublane slices of the VMEM-resident table; no one-hot).
    def gather(b, carry):
        c_idx = c_sm[i * tb + b]
        o_idx = o_sm[i * tb + b]
        c_emb_ref[pl.ds(b, 1), :] = tbl_ref[pl.ds(c_idx, 1), :]
        o_emb_ref[pl.ds(b, 1), :] = tbl_ref[pl.ds(o_idx, 1), :]
        return carry

    lax.fori_loop(0, tb, gather, 0, unroll=(tb <= 32))

    c_emb = c_emb_ref[...]                                   # [TB, E]
    o_emb = o_emb_ref[...]                                   # [TB, E]

    # --- top term (log domain, exact f32): <tbl[outside], tbl[center]>.
    top_dot = jnp.sum(c_emb.astype(jnp.float32) * o_emb.astype(jnp.float32),
                      axis=1, keepdims=True)                 # [TB, 1]

    # --- lower term: scores over the whole vocab on the MXU (contract E vs E,
    #     i.e. the q@k^T pattern), then a numerically stable logsumexp.
    mm = tbl_ref.dtype if matmul_dtype is None else matmul_dtype
    scores = lax.dot_general(                                 # [TB, VOC] f32
        c_emb.astype(mm), tbl_ref[...].astype(mm),
        dimension_numbers=(((1,), (1,)), ((), ())),
        preferred_element_type=jnp.float32)
    m = jnp.max(scores, axis=1, keepdims=True)                # [TB, 1]
    lse = m + jnp.log(jnp.sum(jnp.exp(scores - m), axis=1, keepdims=True))

    # --- lane-dense packed output: col 0 = top_dot, col 1 = lse, rest 0.
    lane = lax.broadcasted_iota(jnp.int32, out_ref.shape, 1)
    out_ref[...] = jnp.where(lane == 0, top_dot,
                             jnp.where(lane == 1, lse, 0.0))


def _pick_b_tile(b):
    # Fill the MXU M dimension, but keep >=2 grid tiles when the batch allows
    # so the "parallel" batch axis can engage both v7x TensorCores.
    for cand in (256, 128, 64, 32, 16, 8):
        if b % cand == 0 and b // cand >= 2:
            return cand
    return b


def _pick_vmem_limit(table_bytes, step_bytes):
    try:
        cap = int(getattr(pltpu.get_tpu_info(), "vmem_capacity_bytes", 64 << 20))
    except Exception:  # no TPU info available (e.g. interpret mode)
        cap = 64 << 20
    need = int(table_bytes + step_bytes) + (8 << 20)   # + compiler headroom
    # Leave ~25% of physical VMEM for internal scratch / pipeline buffers.
    return int(max(32 << 20, min(need, (cap * 3) // 4)))


def _table_block_spec(voc, e):
    index_map = lambda i, *_: (0, 0)                   # grid-invariant block
    try:
        # Single-buffer the table: its block never changes across the grid.
        return pl.BlockSpec((voc, e), index_map, pipeline_mode=pl.Buffered(1))
    except (TypeError, ValueError):
        return pl.BlockSpec((voc, e), index_map)


def skipgram_terms(table, center, outside, all_vocabs, *, tb=None,
                   matmul_dtype=jnp.bfloat16):
    """Returns (top_dot [B,1], lse [B]) with
       top_dot[b] = <tbl[outside[b]], tbl[center[b]]>
       lse[b]     = log sum_w exp(<tbl[w], tbl[center[b]]>)   (full softmax).

    Fast path requires all_vocabs[b] to enumerate the vocabulary (the standard
    skipgram full-softmax usage, as in the reference module)."""
    voc, e = table.shape
    center_flat = center.reshape(-1).astype(jnp.int32)
    outside_flat = outside.reshape(-1).astype(jnp.int32)
    b = center_flat.shape[0]

    if all_vocabs.shape[-1] != voc:
        # TODO(synk): arbitrary all_vocabs subsets would need a per-row column
        # gather of the score matrix; the skipgram loss always passes the full
        # vocabulary, so only that case is implemented in-kernel.
        raise NotImplementedError("all_vocabs must enumerate the full vocabulary")

    if tb is None:
        tb = _pick_b_tile(b)
    assert b % tb == 0, "batch must be divisible by the B-tile size"
    assert tb % 8 == 0 or tb == b, "B-tile must be sublane aligned (mult of 8)"
    grid = (b // tb,)

    table_bytes = voc * e * table.dtype.itemsize
    step_bytes = 4 * (2 * tb * _OUT_LANES      # double-buffered output block
                      + 2 * tb * e             # c_emb / o_emb scratch
                      + 2 * tb * voc)          # scores + exp temporaries
    vmem_limit = _pick_vmem_limit(table_bytes, step_bytes)

    cost = pl.CostEstimate(
        flops=2 * b * e * voc + 4 * b * e,
        transcendentals=b * voc + b,
        bytes_accessed=int(table_bytes + 8 * b + 4 * b * _OUT_LANES),
    )

    grid_spec = pltpu.PrefetchScalarGridSpec(
        num_scalar_prefetch=2,                 # center + outside indices -> SMEM
        grid=grid,
        in_specs=[_table_block_spec(voc, e)],
        out_specs=pl.BlockSpec((tb, _OUT_LANES), lambda i, *_: (i, 0)),
        scratch_shapes=[pltpu.VMEM((tb, e), table.dtype),
                        pltpu.VMEM((tb, e), table.dtype)],
    )

    out = pl.pallas_call(
        functools.partial(_skipgram_kernel, matmul_dtype=matmul_dtype),
        out_shape=jax.ShapeDtypeStruct((b, _OUT_LANES), jnp.float32),
        grid_spec=grid_spec,
        compiler_params=pltpu.CompilerParams(
            dimension_semantics=("parallel",),       # megacore over B-tiles
            vmem_limit_bytes=vmem_limit,
        ),
        cost_estimate=cost,
    )(center_flat, outside_flat, table)

    top_dot = out[:, 0:1]   # [B, 1]
    lse = out[:, 1]         # [B]
    return top_dot, lse


def skipgram_loss(params, center, outside, all_vocabs, *, matmul_dtype=jnp.bfloat16):
    """Forward pass of the Skipgram module (embedding_center used for all
    lookups, exactly like the PyTorch reference)."""
    table = params["embedding_center"]
    top_dot, lse = skipgram_terms(table, center, outside, all_vocabs,
                                  matmul_dtype=matmul_dtype)
    # torch: -mean(log(top_term / lower_term_sum)) with top_term [B,1] and
    # lower_term_sum [B]; the division broadcasts to [B,B].  In log space that
    # is top_dot[:, None] - lse[None, :] -- identical math, no exp overflow.
    return -jnp.mean(top_dot - lse[None, :])


def _reference_loss(params, center, outside, all_vocabs):
    """Pure-JAX transcription of the PyTorch forward (exp/log form)."""
    tbl = params["embedding_center"]
    c_emb = tbl[center]                 # [B, 1, E]
    o_emb = tbl[outside]                # [B, 1, E]
    av_emb = tbl[all_vocabs]            # [B, V, E]
    top = jnp.exp(jnp.einsum("bie,bje->bij", o_emb, c_emb)[:, :, 0])   # [B, 1]
    lower = jnp.einsum("bve,bje->bvj", av_emb, c_emb)[:, :, 0]         # [B, V]
    lsum = jnp.sum(jnp.exp(lower), axis=1)                             # [B]
    return -jnp.mean(jnp.log(top / lsum))


if __name__ == "__main__":
    voc_size, emb_size = 32, 128
    B, V = 8, voc_size

    key = jax.random.PRNGKey(0)
    k_c, k_o, k_idx = jax.random.split(key, 3)
    # Scale 0.1 keeps the *reference's* exp() finite; the Pallas kernel itself
    # is log-sum-exp stabilized and does not need this.
    params = {
        "embedding_center": 0.1 * jax.random.normal(k_c, (voc_size, emb_size), jnp.float32),
        "embedding_outside": 0.1 * jax.random.normal(k_o, (voc_size, emb_size), jnp.float32),
        # (embedding_outside is unused in forward, matching the reference module)
    }

    k1, k2 = jax.random.split(k_idx)
    center = jax.random.randint(k1, (B, 1), 0, voc_size, dtype=jnp.int32)
    outside = jax.random.randint(k2, (B, 1), 0, voc_size, dtype=jnp.int32)
    all_vocabs = jnp.tile(jnp.arange(voc_size, dtype=jnp.int32)[None, :], (B, 1))

    ref = _reference_loss(params, center, outside, all_vocabs)

    # f32 MXU path: tight check against the f32 reference.
    loss_f32 = jax.jit(functools.partial(skipgram_loss, matmul_dtype=jnp.float32))(
        params, center, outside, all_vocabs)
    loss_f32 = jax.block_until_ready(loss_f32)
    assert jnp.allclose(loss_f32, ref, rtol=1e-4, atol=1e-4), (loss_f32, ref)

    # Default bf16-MXU path (v6e/v7x native rate): looser tolerance, f32 accum.
    loss_bf16 = jax.jit(skipgram_loss)(params, center, outside, all_vocabs)
    loss_bf16 = jax.block_until_ready(loss_bf16)
    assert jnp.allclose(loss_bf16, ref, rtol=2e-2, atol=2e-2), (loss_bf16, ref)

    print("KERNEL_OK")
</pallas_src>

<mosaic_0001>
module attributes {stable_mosaic.version = 11 : i64} {
  func.func @_skipgram_kernel(%arg0: i32, %arg1: memref<8xi32, #tpu.memory_space<smem>>, %arg2: memref<8xi32, #tpu.memory_space<smem>>, %arg3: memref<32x128xf32, #tpu.memory_space<vmem>>, %arg4: memref<8x128xf32, #tpu.memory_space<vmem>>, %arg5: memref<8x128xf32, #tpu.memory_space<vmem>>, %arg6: memref<8x128xf32, #tpu.memory_space<vmem>>) attributes {dimension_semantics = [#tpu.dimension_semantics<parallel>], iteration_bounds = array<i64: 1>, scalar_prefetch = 2 : i64, scratch_operands = 2 : i64, tpu.core_type = #tpu.core_type<tc>, window_params = [{pipeline_mode = #tpu.pipeline_mode<synchronous>, transform_indices = @transform_0, window_bounds = array<i64: 32, 128>}, {transform_indices = @transform_1, window_bounds = array<i64: 8, 128>}]} {
    %c0_i32 = arith.constant 0 : i32
    %c8_i32 = arith.constant 8 : i32
    %0 = arith.muli %arg0, %c8_i32 : i32
    %1 = arith.addi %0, %c0_i32 : i32
    %2 = arith.index_cast %1 : i32 to index
    %3 = memref.load %arg1[%2] : memref<8xi32, #tpu.memory_space<smem>>
    %c8_i32_0 = arith.constant 8 : i32
    %4 = arith.muli %arg0, %c8_i32_0 : i32
    %5 = arith.addi %4, %c0_i32 : i32
    %6 = arith.index_cast %5 : i32 to index
    %7 = memref.load %arg2[%6] : memref<8xi32, #tpu.memory_space<smem>>
    %8 = arith.index_cast %3 : i32 to index
    %c0 = arith.constant 0 : index
    %9 = vector.load %arg3[%8, %c0] : memref<32x128xf32, #tpu.memory_space<vmem>>, vector<1x128xf32>
    %10 = arith.index_cast %c0_i32 : i32 to index
    %c0_1 = arith.constant 0 : index
    %11 = vector.load %arg5[%10, %c0_1] : memref<8x128xf32, #tpu.memory_space<vmem>>, vector<1x128xf32>
    tpu.vector_store %arg5[%10, %c0_1], %9 {strides = array<i32>} : memref<8x128xf32, #tpu.memory_space<vmem>>, vector<1x128xf32>,
    %12 = arith.index_cast %7 : i32 to index
    %c0_2 = arith.constant 0 : index
    %13 = vector.load %arg3[%12, %c0_2] : memref<32x128xf32, #tpu.memory_space<vmem>>, vector<1x128xf32>
    %14 = arith.index_cast %c0_i32 : i32 to index
    %c0_3 = arith.constant 0 : index
    %15 = vector.load %arg6[%14, %c0_3] : memref<8x128xf32, #tpu.memory_space<vmem>>, vector<1x128xf32>
    tpu.vector_store %arg6[%14, %c0_3], %13 {strides = array<i32>} : memref<8x128xf32, #tpu.memory_space<vmem>>, vector<1x128xf32>,
    %c1_i32 = arith.constant 1 : i32
    %c8_i32_4 = arith.constant 8 : i32
    %16 = arith.muli %arg0, %c8_i32_4 : i32
    %17 = arith.addi %16, %c1_i32 : i32
    %18 = arith.index_cast %17 : i32 to index
    %19 = memref.load %arg1[%18] : memref<8xi32, #tpu.memory_space<smem>>
    %c8_i32_5 = arith.constant 8 : i32
    %20 = arith.muli %arg0, %c8_i32_5 : i32
    %21 = arith.addi %20, %c1_i32 : i32
    %22 = arith.index_cast %21 : i32 to index
    %23 = memref.load %arg2[%22] : memref<8xi32, #tpu.memory_space<smem>>
    %24 = arith.index_cast %19 : i32 to index
    %c0_6 = arith.constant 0 : index
    %25 = vector.load %arg3[%24, %c0_6] : memref<32x128xf32, #tpu.memory_space<vmem>>, vector<1x128xf32>
    %26 = arith.index_cast %c1_i32 : i32 to index
    %c0_7 = arith.constant 0 : index
    %27 = vector.load %arg5[%26, %c0_7] : memref<8x128xf32, #tpu.memory_space<vmem>>, vector<1x128xf32>
    tpu.vector_store %arg5[%26, %c0_7], %25 {strides = array<i32>} : memref<8x128xf32, #tpu.memory_space<vmem>>, vector<1x128xf32>,
    %28 = arith.index_cast %23 : i32 to index
    %c0_8 = arith.constant 0 : index
    %29 = vector.load %arg3[%28, %c0_8] : memref<32x128xf32, #tpu.memory_space<vmem>>, vector<1x128xf32>
    %30 = arith.index_cast %c1_i32 : i32 to index
    %c0_9 = arith.constant 0 : index
    %31 = vector.load %arg6[%30, %c0_9] : memref<8x128xf32, #tpu.memory_space<vmem>>, vector<1x128xf32>
    tpu.vector_store %arg6[%30, %c0_9], %29 {strides = array<i32>} : memref<8x128xf32, #tpu.memory_space<vmem>>, vector<1x128xf32>,
    %c2_i32 = arith.constant 2 : i32
    %c8_i32_10 = arith.constant 8 : i32
    %32 = arith.muli %arg0, %c8_i32_10 : i32
    %33 = arith.addi %32, %c2_i32 : i32
    %34 = arith.index_cast %33 : i32 to index
    %35 = memref.load %arg1[%34] : memref<8xi32, #tpu.memory_space<smem>>
    %c8_i32_11 = arith.constant 8 : i32
    %36 = arith.muli %arg0, %c8_i32_11 : i32
    %37 = arith.addi %36, %c2_i32 : i32
    %38 = arith.index_cast %37 : i32 to index
    %39 = memref.load %arg2[%38] : memref<8xi32, #tpu.memory_space<smem>>
    %40 = arith.index_cast %35 : i32 to index
    %c0_12 = arith.constant 0 : index
    %41 = vector.load %arg3[%40, %c0_12] : memref<32x128xf32, #tpu.memory_space<vmem>>, vector<1x128xf32>
    %42 = arith.index_cast %c2_i32 : i32 to index
    %c0_13 = arith.constant 0 : index
    %43 = vector.load %arg5[%42, %c0_13] : memref<8x128xf32, #tpu.memory_space<vmem>>, vector<1x128xf32>
    tpu.vector_store %arg5[%42, %c0_13], %41 {strides = array<i32>} : memref<8x128xf32, #tpu.memory_space<vmem>>, vector<1x128xf32>,
    %44 = arith.index_cast %39 : i32 to index
    %c0_14 = arith.constant 0 : index
    %45 = vector.load %arg3[%44, %c0_14] : memref<32x128xf32, #tpu.memory_space<vmem>>, vector<1x128xf32>
    %46 = arith.index_cast %c2_i32 : i32 to index
    %c0_15 = arith.constant 0 : index
    %47 = vector.load %arg6[%46, %c0_15] : memref<8x128xf32, #tpu.memory_space<vmem>>, vector<1x128xf32>
    tpu.vector_store %arg6[%46, %c0_15], %45 {strides = array<i32>} : memref<8x128xf32, #tpu.memory_space<vmem>>, vector<1x128xf32>,
    %c3_i32 = arith.constant 3 : i32
    %c8_i32_16 = arith.constant 8 : i32
    %48 = arith.muli %arg0, %c8_i32_16 : i32
    %49 = arith.addi %48, %c3_i32 : i32
    %50 = arith.index_cast %49 : i32 to index
    %51 = memref.load %arg1[%50] : memref<8xi32, #tpu.memory_space<smem>>
    %c8_i32_17 = arith.constant 8 : i32
    %52 = arith.muli %arg0, %c8_i32_17 : i32
    %53 = arith.addi %52, %c3_i32 : i32
    %54 = arith.index_cast %53 : i32 to index
    %55 = memref.load %arg2[%54] : memref<8xi32, #tpu.memory_space<smem>>
    %56 = arith.index_cast %51 : i32 to index
    %c0_18 = arith.constant 0 : index
    %57 = vector.load %arg3[%56, %c0_18] : memref<32x128xf32, #tpu.memory_space<vmem>>, vector<1x128xf32>
    %58 = arith.index_cast %c3_i32 : i32 to index
    %c0_19 = arith.constant 0 : index
    %59 = vector.load %arg5[%58, %c0_19] : memref<8x128xf32, #tpu.memory_space<vmem>>, vector<1x128xf32>
    tpu.vector_store %arg5[%58, %c0_19], %57 {strides = array<i32>} : memref<8x128xf32, #tpu.memory_space<vmem>>, vector<1x128xf32>,
    %60 = arith.index_cast %55 : i32 to index
    %c0_20 = arith.constant 0 : index
    %61 = vector.load %arg3[%60, %c0_20] : memref<32x128xf32, #tpu.memory_space<vmem>>, vector<1x128xf32>
    %62 = arith.index_cast %c3_i32 : i32 to index
    %c0_21 = arith.constant 0 : index
    %63 = vector.load %arg6[%62, %c0_21] : memref<8x128xf32, #tpu.memory_space<vmem>>, vector<1x128xf32>
    tpu.vector_store %arg6[%62, %c0_21], %61 {strides = array<i32>} : memref<8x128xf32, #tpu.memory_space<vmem>>, vector<1x128xf32>,
    %c4_i32 = arith.constant 4 : i32
    %c8_i32_22 = arith.constant 8 : i32
    %64 = arith.muli %arg0, %c8_i32_22 : i32
    %65 = arith.addi %64, %c4_i32 : i32
    %66 = arith.index_cast %65 : i32 to index
    %67 = memref.load %arg1[%66] : memref<8xi32, #tpu.memory_space<smem>>
    %c8_i32_23 = arith.constant 8 : i32
    %68 = arith.muli %arg0, %c8_i32_23 : i32
    %69 = arith.addi %68, %c4_i32 : i32
    %70 = arith.index_cast %69 : i32 to index
    %71 = memref.load %arg2[%70] : memref<8xi32, #tpu.memory_space<smem>>
    %72 = arith.index_cast %67 : i32 to index
    %c0_24 = arith.constant 0 : index
    %73 = vector.load %arg3[%72, %c0_24] : memref<32x128xf32, #tpu.memory_space<vmem>>, vector<1x128xf32>
    %74 = arith.index_cast %c4_i32 : i32 to index
    %c0_25 = arith.constant 0 : index
    %75 = vector.load %arg5[%74, %c0_25] : memref<8x128xf32, #tpu.memory_space<vmem>>, vector<1x128xf32>
    tpu.vector_store %arg5[%74, %c0_25], %73 {strides = array<i32>} : memref<8x128xf32, #tpu.memory_space<vmem>>, vector<1x128xf32>,
    %76 = arith.index_cast %71 : i32 to index
    %c0_26 = arith.constant 0 : index
    %77 = vector.load %arg3[%76, %c0_26] : memref<32x128xf32, #tpu.memory_space<vmem>>, vector<1x128xf32>
    %78 = arith.index_cast %c4_i32 : i32 to index
    %c0_27 = arith.constant 0 : index
    %79 = vector.load %arg6[%78, %c0_27] : memref<8x128xf32, #tpu.memory_space<vmem>>, vector<1x128xf32>
    tpu.vector_store %arg6[%78, %c0_27], %77 {strides = array<i32>} : memref<8x128xf32, #tpu.memory_space<vmem>>, vector<1x128xf32>,
    %c5_i32 = arith.constant 5 : i32
    %c8_i32_28 = arith.constant 8 : i32
    %80 = arith.muli %arg0, %c8_i32_28 : i32
    %81 = arith.addi %80, %c5_i32 : i32
    %82 = arith.index_cast %81 : i32 to index
    %83 = memref.load %arg1[%82] : memref<8xi32, #tpu.memory_space<smem>>
    %c8_i32_29 = arith.constant 8 : i32
    %84 = arith.muli %arg0, %c8_i32_29 : i32
    %85 = arith.addi %84, %c5_i32 : i32
    %86 = arith.index_cast %85 : i32 to index
    %87 = memref.load %arg2[%86] : memref<8xi32, #tpu.memory_space<smem>>
    %88 = arith.index_cast %83 : i32 to index
    %c0_30 = arith.constant 0 : index
    %89 = vector.load %arg3[%88, %c0_30] : memref<32x128xf32, #tpu.memory_space<vmem>>, vector<1x128xf32>
    %90 = arith.index_cast %c5_i32 : i32 to index
    %c0_31 = arith.constant 0 : index
    %91 = vector.load %arg5[%90, %c0_31] : memref<8x128xf32, #tpu.memory_space<vmem>>, vector<1x128xf32>
    tpu.vector_store %arg5[%90, %c0_31], %89 {strides = array<i32>} : memref<8x128xf32, #tpu.memory_space<vmem>>, vector<1x128xf32>,
    %92 = arith.index_cast %87 : i32 to index
    %c0_32 = arith.constant 0 : index
    %93 = vector.load %arg3[%92, %c0_32] : memref<32x128xf32, #tpu.memory_space<vmem>>, vector<1x128xf32>
    %94 = arith.index_cast %c5_i32 : i32 to index
    %c0_33 = arith.constant 0 : index
    %95 = vector.load %arg6[%94, %c0_33] : memref<8x128xf32, #tpu.memory_space<vmem>>, vector<1x128xf32>
    tpu.vector_store %arg6[%94, %c0_33], %93 {strides = array<i32>} : memref<8x128xf32, #tpu.memory_space<vmem>>, vector<1x128xf32>,
    %c6_i32 = arith.constant 6 : i32
    %c8_i32_34 = arith.constant 8 : i32
    %96 = arith.muli %arg0, %c8_i32_34 : i32
    %97 = arith.addi %96, %c6_i32 : i32
    %98 = arith.index_cast %97 : i32 to index
    %99 = memref.load %arg1[%98] : memref<8xi32, #tpu.memory_space<smem>>
    %c8_i32_35 = arith.constant 8 : i32
    %100 = arith.muli %arg0, %c8_i32_35 : i32
    %101 = arith.addi %100, %c6_i32 : i32
    %102 = arith.index_cast %101 : i32 to index
    %103 = memref.load %arg2[%102] : memref<8xi32, #tpu.memory_space<smem>>
    %104 = arith.index_cast %99 : i32 to index
    %c0_36 = arith.constant 0 : index
    %105 = vector.load %arg3[%104, %c0_36] : memref<32x128xf32, #tpu.memory_space<vmem>>, vector<1x128xf32>
    %106 = arith.index_cast %c6_i32 : i32 to index
    %c0_37 = arith.constant 0 : index
    %107 = vector.load %arg5[%106, %c0_37] : memref<8x128xf32, #tpu.memory_space<vmem>>, vector<1x128xf32>
    tpu.vector_store %arg5[%106, %c0_37], %105 {strides = array<i32>} : memref<8x128xf32, #tpu.memory_space<vmem>>, vector<1x128xf32>,
    %108 = arith.index_cast %103 : i32 to index
    %c0_38 = arith.constant 0 : index
    %109 = vector.load %arg3[%108, %c0_38] : memref<32x128xf32, #tpu.memory_space<vmem>>, vector<1x128xf32>
    %110 = arith.index_cast %c6_i32 : i32 to index
    %c0_39 = arith.constant 0 : index
    %111 = vector.load %arg6[%110, %c0_39] : memref<8x128xf32, #tpu.memory_space<vmem>>, vector<1x128xf32>
    tpu.vector_store %arg6[%110, %c0_39], %109 {strides = array<i32>} : memref<8x128xf32, #tpu.memory_space<vmem>>, vector<1x128xf32>,
    %c7_i32 = arith.constant 7 : i32
    %c8_i32_40 = arith.constant 8 : i32
    %112 = arith.muli %arg0, %c8_i32_40 : i32
    %113 = arith.addi %112, %c7_i32 : i32
    %114 = arith.index_cast %113 : i32 to index
    %115 = memref.load %arg1[%114] : memref<8xi32, #tpu.memory_space<smem>>
    %c8_i32_41 = arith.constant 8 : i32
    %116 = arith.muli %arg0, %c8_i32_41 : i32
    %117 = arith.addi %116, %c7_i32 : i32
    %118 = arith.index_cast %117 : i32 to index
    %119 = memref.load %arg2[%118] : memref<8xi32, #tpu.memory_space<smem>>
    %120 = arith.index_cast %115 : i32 to index
    %c0_42 = arith.constant 0 : index
    %121 = vector.load %arg3[%120, %c0_42] : memref<32x128xf32, #tpu.memory_space<vmem>>, vector<1x128xf32>
    %122 = arith.index_cast %c7_i32 : i32 to index
    %c0_43 = arith.constant 0 : index
    %123 = vector.load %arg5[%122, %c0_43] : memref<8x128xf32, #tpu.memory_space<vmem>>, vector<1x128xf32>
    tpu.vector_store %arg5[%122, %c0_43], %121 {strides = array<i32>} : memref<8x128xf32, #tpu.memory_space<vmem>>, vector<1x128xf32>,
    %124 = arith.index_cast %119 : i32 to index
    %c0_44 = arith.constant 0 : index
    %125 = vector.load %arg3[%124, %c0_44] : memref<32x128xf32, #tpu.memory_space<vmem>>, vector<1x128xf32>
    %126 = arith.index_cast %c7_i32 : i32 to index
    %c0_45 = arith.constant 0 : index
    %127 = vector.load %arg6[%126, %c0_45] : memref<8x128xf32, #tpu.memory_space<vmem>>, vector<1x128xf32>
    tpu.vector_store %arg6[%126, %c0_45], %125 {strides = array<i32>} : memref<8x128xf32, #tpu.memory_space<vmem>>, vector<1x128xf32>,
    %c8_i32_46 = arith.constant 8 : i32
    %c0_47 = arith.constant 0 : index
    %c0_48 = arith.constant 0 : index
    %128 = vector.load %arg5[%c0_47, %c0_48] : memref<8x128xf32, #tpu.memory_space<vmem>>, vector<8x128xf32>
    %c0_49 = arith.constant 0 : index
    %c0_50 = arith.constant 0 : index
    %129 = vector.load %arg6[%c0_49, %c0_50] : memref<8x128xf32, #tpu.memory_space<vmem>>, vector<8x128xf32>
    %130 = arith.mulf %128, %129 : vector<8x128xf32>
    %cst = arith.constant dense<0.000000e+00> : vector<8xf32>
    %131 = vector.multi_reduction <add>, %130, %cst [1] : vector<8x128xf32> to vector<8xf32>
    %132 = vector.shape_cast %131 : vector<8xf32> to vector<8x1xf32>
    %c0_51 = arith.constant 0 : index
    %c0_52 = arith.constant 0 : index
    %133 = vector.load %arg3[%c0_51, %c0_52] : memref<32x128xf32, #tpu.memory_space<vmem>>, vector<32x128xf32>
    %cst_53 = arith.constant dense<0.000000e+00> : vector<8x32xf32>
    %134 = tpu.matmul %128, %133, %cst_53 {dimension_numbers = #tpu.dot_dimension_numbers<[1], [1], [0], [0], [0, 0, 1, 0], [], []>} : vector<8x128xf32>, vector<32x128xf32>, vector<8x32xf32> -> vector<8x32xf32>
    %cst_54 = arith.constant dense<0xFF800000> : vector<8xf32>
    %135 = vector.multi_reduction <maximumf>, %134, %cst_54 [1] : vector<8x32xf32> to vector<8xf32>
    %136 = vector.shape_cast %135 : vector<8xf32> to vector<8x1xf32>
    %137 = vector.broadcast %136 : vector<8x1xf32> to vector<8x32xf32>
    %138 = arith.subf %134, %137 : vector<8x32xf32>
    %139 = math.exp %138 : vector<8x32xf32>
    %cst_55 = arith.constant dense<0.000000e+00> : vector<8xf32>
    %140 = vector.multi_reduction <add>, %139, %cst_55 [1] : vector<8x32xf32> to vector<8xf32>
    %141 = vector.shape_cast %140 : vector<8xf32> to vector<8x1xf32>
    %142 = math.log %141 : vector<8x1xf32>
    %143 = arith.addf %136, %142 : vector<8x1xf32>
    %144 = tpu.iota {dimensions = array<i32: 1>} : vector<8x128xi32>
    %c0_i32_56 = arith.constant 0 : i32
    %145 = vector.broadcast %c0_i32_56 : i32 to vector<8x128xi32>
    %146 = arith.cmpi eq, %144, %145 : vector<8x128xi32>
    %c1_i32_57 = arith.constant 1 : i32
    %147 = vector.broadcast %c1_i32_57 : i32 to vector<8x128xi32>
    %148 = arith.cmpi eq, %144, %147 : vector<8x128xi32>
    %cst_58 = arith.constant 0.000000e+00 : f32
    %149 = vector.shape_cast %143 : vector<8x1xf32> to vector<8x1xf32>
    %150 = vector.broadcast %149 : vector<8x1xf32> to vector<8x128xf32>
    %151 = vector.broadcast %cst_58 : f32 to vector<8x128xf32>
    %152 = arith.select %148, %150, %151 : vector<8x128xi1>, vector<8x128xf32>
    %153 = vector.shape_cast %132 : vector<8x1xf32> to vector<8x1xf32>
    %154 = vector.broadcast %153 : vector<8x1xf32> to vector<8x128xf32>
    %155 = arith.select %146, %154, %152 : vector<8x128xi1>, vector<8x128xf32>
    %c0_59 = arith.constant 0 : index
    %c0_60 = arith.constant 0 : index
    %156 = vector.load %arg4[%c0_59, %c0_60] : memref<8x128xf32, #tpu.memory_space<vmem>>, vector<8x128xf32>
    tpu.vector_store %arg4[%c0_59, %c0_60], %155 {strides = array<i32>} : memref<8x128xf32, #tpu.memory_space<vmem>>, vector<8x128xf32>,
    return
  }
  func.func @transform_0(%arg0: i32, %arg1: memref<8xi32, #tpu.memory_space<smem>>, %arg2: memref<8xi32, #tpu.memory_space<smem>>) -> (i32, i32) {
    %c0_i32 = arith.constant 0 : i32
    %c0_i32_0 = arith.constant 0 : i32
    %c0_i32_1 = arith.constant 0 : i32
    return %c0_i32, %c0_i32_0 : i32, i32
  }
  func.func @transform_1(%arg0: i32, %arg1: memref<8xi32, #tpu.memory_space<smem>>, %arg2: memref<8xi32, #tpu.memory_space<smem>>) -> (i32, i32) {
    %c0_i32 = arith.constant 0 : i32
    %c0_i32_0 = arith.constant 0 : i32
    return %arg0, %c0_i32 : i32, i32
  }
}

</mosaic_0001>

<bundles_post_ra>
// kernel: skipgram_loss.1
= control target key start
LH: loop header
LB: loop body
LE: loop exit
PB: predicated region body
PF: predicated region fallthrough
CT: control target
= control target key end

     0   :  { %s378_s0 = inlined_call_operand.vmem [shape: s32[8], index: 0, kind: input, shape index: {}]   ;;  %s379_s2 = inlined_call_operand.hbm [shape: f32[32,128], index: 2, kind: input, shape index: {}]   ;;  %s380_s3 = inlined_call_operand.vmem [shape: f32[8,128], index: 3, kind: output, shape index: {}]   ;;  %s381_s1 = inlined_call_operand.vmem [shape: s32[8], index: 1, kind: input, shape index: {}]  }
   0x1   :  { %s8_s14 = sshll.u32 %s378_s0, 4  ;;  %s12_s17 = sshll.u32 %s381_s1, 4  ;;  %s9_s14 = int_to_ptr.vmem [resolvable:$true] %s8_s14  ;;  %s13_s17 = int_to_ptr.vmem [resolvable:$true] %s12_s17 }
   0x2   :  { %s274_s18 = scalar_lea.vmem %s9_s14, 16  ;;  %p279_p1 = scmp.lt.s32.totalorder %s9_s14, %s9_s14 }
   0x3   :  { %p275_p0 = scmp.ne.s32.totalorder %s9_s14, %s274_s18  ;;  %p280_p2 = scmp.lt.s32.totalorder %s274_s18, %s274_s18 }
   0x5   :  { %p281_p3 = por %p280_p2, %p279_p1 }
   0x7   :  { %p282_p4 = pnand %p281_p3, %p275_p0 }
   0x9   :  { %285 = shalt.err (!%p282_p4)  }
   0xa   :  { %s324_s19 = smov [#allocation5]   ;;  %s286_s20 = scalar_lea.vmem %s13_s17, 16 }
   0xb   :  { %11 = dma.vmem_to_smem %s9_s14, 16, %s324_s19, [#allocation4] }
   0xc   :  { %p287_p5 = scmp.ne.s32.totalorder %s13_s17, %s286_s20  ;;  %p291_p6 = scmp.lt.s32.totalorder %s13_s17, %s13_s17 }
   0xd   :  { %p292_p7 = scmp.lt.s32.totalorder %s286_s20, %s286_s20 }
   0xf   :  { %p293_p8 = por %p292_p7, %p291_p6 }
  0x11   :  { %p294_p9 = pnand %p293_p8, %p287_p5 }
  0x13   :  { %297 = shalt.err (!%p294_p9)  }
  0x14   :  { %s325_s0 = smov [#allocation6]  }
  0x15   :  { %15 = dma.vmem_to_smem %s13_s17, 16, %s325_s0, [#allocation4] }
  0x16   :  { %320 = dma.done.wait [#allocation4], 32 }
  0x17   :  { %321 = vsyncadd [#allocation4], 4294967264 }
  0x18   :  { %17 = sfence }
  0x19   :  { %18 = vsyncpa [#allocation8], 0  ;;  %s326_s1 = smov [#allocation7]   ;;  %s298_s24 = scalar_lea.hbm %s379_s2, 512 }
  0x1a   :  { %s24_s21 = sshll.u32 %s326_s1, 4  ;;  %p299_p10 = scmp.ne.s32.totalorder %s379_s2, %s298_s24  ;;  %s25_s21 = int_to_ptr.vmem [resolvable:$true] %s24_s21 }
  0x1b   :  { %p302_p11 = scmp.lt.u32.totalorder %s298_s24, %s379_s2 }
  0x1d   :  { %p304_p12 = pnand %p302_p11, %p299_p10 }
  0x1f   :  { %307 = shalt.err (!%p304_p12)
}
  0x20   :  { %s308_s29 = scalar_lea.vmem %s25_s21, 512  ;;  %p313_p0 = scmp.lt.s32.totalorder %s25_s21, %s25_s21 }
  0x21   :  { %p309_p13 = scmp.ne.s32.totalorder %s25_s21, %s308_s29  ;;  %p314_p1 = scmp.lt.s32.totalorder %s308_s29, %s308_s29 }
  0x23   :  { %p315_p2 = por %p314_p1, %p313_p0 }
  0x25   :  { %p316_p3 = pnand %p315_p2, %p309_p13 }
  0x27   :  { %319 = shalt.err (!%p316_p3)
}
  0x28   :  { %s327_s30 = smov 128   ;;  %s328_s4 = smov 8  }
  0x29   :  { %30 = dma.hbm_to_vmem [thread:$0]  %s379_s2, 512, %s25_s21, [#allocation8], %s327_s30, %s327_s30, %s328_s4  }
  0x2a   :  { %322 = dma.done.wait [#allocation8], 512  }
  0x2b   :  { %323 = vsyncadd [#allocation8], 4294966784  ;;  %v329_v0 = vmov 0.0|0.0   ;;  %vm330_vm0 = vmmov 0   ;;  %v331_v1 = vmov 0.0   ;;  %s35_s7 = sld [smem:[#allocation5]]  ;;  %v198_v36 = vlaneseq }
  0x2c   :  { %256 = vmatprep.subr.bf16.mxu0 %v329_v0  ;;  %253 = vmatprep.mubr.msk.f32.mxu0 %vm330_vm0, %v331_v1  ;;  %s226_s8 = sld [smem:[#allocation5 + $0x1]]  ;;  %s228_s9 = sld [smem:[#allocation5 + $0x2]]  ;;  %v111_v2 = vld [vmem:[#allocation7] sm:$0xff]  ;;  %v112_v3 = vld [vmem:[#allocation7 + $0x8] sm:$0xff]  ;;  %v113_v7 = vld [vmem:[#allocation7 + $0x10] sm:$0xff]  ;;  %vm185_vm1 = vcmask 261120  }
  0x2d   :  { %s230_s10 = sld [smem:[#allocation5 + $0x3]]  ;;  %s232_s11 = sld [smem:[#allocation5 + $0x4]]  ;;  %v257_v4 = vpack.c.bf16 %v112_v3, %v111_v2  ;;  %v114_v11 = vld [vmem:[#allocation7 + $0x18] sm:$0xff]  ;;  %v199_v37 = vand.u32 127, %v198_v36 }
  0x2e   :  { %s234_s12 = sld [smem:[#allocation5 + $0x5]]  ;;  %s236_s13 = sld [smem:[#allocation5 + $0x6]]  ;;  %v260_v15 = vpack.c.bf16 %v114_v11, %v113_v7 }
  0x2f   :  { %s370_s14 = sld [smem:[#allocation5 + $0x7]]  ;;  %258 = vmatpush3.bf16.xpose.msra.mxu0 %v257_v4  ;;  %s36_s1 = sld [smem:[#allocation6]]  ;;  %vm201_vm2 = vcmp.eq.s32.totalorder %v199_v37, 1  ;;  %vm200_vm3 = vcmp.eq.s32.totalorder %v199_v37, 0 }
  0x30   :  { %259 = vmatprep.subr.bf16.mxu0 %v329_v0  ;;  %s227_s21 = sld [smem:[#allocation6 + $0x1]]  ;;  %s229_s22 = sld [smem:[#allocation6 + $0x2]] }
  0x31   :  { %s37_s2 = scalar_lea.vmem [#allocation7], %s35_s7  ;;  %s231_s23 = sld [smem:[#allocation6 + $0x3]] }
  0x32   :  { %v38_v5 = vld [vmem:[%s37_s2] sm:$0x1]  ;;  %s46_s15 = scalar_lea.vmem [#allocation7], %s226_s8  ;;  %s55_s16 = scalar_lea.vmem [#allocation7], %s228_s9 }
  0x33   :  { %v47_v6 = vld [vmem:[%s46_s15] sm:$0x1]  ;;  %39 = vst [vmem:[#allocation2] sm:$0x1] %v38_v5  ;;  %s64_s17 = scalar_lea.vmem [#allocation7], %s230_s10  ;;  %s73_s18 = scalar_lea.vmem [#allocation7], %s232_s11 }
  0x34   :  { %48 = vst [vmem:[#allocation2 + $0x1] sm:$0x1] %v47_v6  ;;  %v56_v8 = vld [vmem:[%s55_s16] sm:$0x1]  ;;  %s82_s19 = scalar_lea.vmem [#allocation7], %s234_s12  ;;  %s91_s20 = scalar_lea.vmem [#allocation7], %s236_s13 }
  0x35   :  { %57 = vst [vmem:[#allocation2 + $0x2] sm:$0x1] %v56_v8  ;;  %v65_v9 = vld [vmem:[%s64_s17] sm:$0x1]  ;;  %s100_s0 = scalar_lea.vmem [#allocation7], %s370_s14  ;;  %s233_s24 = sld [smem:[#allocation6 + $0x4]] }
  0x36   :  { %v74_v10 = vld [vmem:[%s73_s18] sm:$0x1]  ;;  %66 = vst [vmem:[#allocation2 + $0x3] sm:$0x1] %v65_v9  ;;  %s235_s25 = sld [smem:[#allocation6 + $0x5]]  ;;  %s237_s26 = sld [smem:[#allocation6 + $0x6]] }
  0x37   :  { %75 = vst [vmem:[#allocation2 + $0x4] sm:$0x1] %v74_v10  ;;  %v83_v12 = vld [vmem:[%s82_s19] sm:$0x1]  ;;  %261 = vmatpush3.bf16.xpose.msra.mxu0 %v260_v15  ;;  %s239_s27 = sld [smem:[#allocation6 + $0x7]]  ;;  %s40_s28 = scalar_lea.vmem [#allocation7], %s36_s1 }
  0x38   :  { %v92_v13 = vld [vmem:[%s91_s20] sm:$0x1]  ;;  %84 = vst [vmem:[#allocation2 + $0x5] sm:$0x1] %v83_v12  ;;  %s49_s29 = scalar_lea.vmem [#allocation7], %s227_s21  ;;  %s58_s30 = scalar_lea.vmem [#allocation7], %s229_s22 }
  0x39   :  { %93 = vst [vmem:[#allocation2 + $0x6] sm:$0x1] %v92_v13  ;;  %v101_v14 = vld [vmem:[%s100_s0] sm:$0x1]  ;;  %s67_s4 = scalar_lea.vmem [#allocation7], %s231_s23 }
  0x3a   :  { %102 = vst [vmem:[#allocation2 + $0x7] sm:$0x1] %v101_v14  ;;  %v41_v20 = vld [vmem:[%s40_s28] sm:$0x1] }
  0x3b   :  { %v50_v21 = vld [vmem:[%s49_s29] sm:$0x1]  ;;  %42 = vst [vmem:[#allocation3] sm:$0x1] %v41_v20  ;;  %s76_s5 = scalar_lea.vmem [#allocation7], %s233_s24 }
  0x3c   :  { %51 = vst [vmem:[#allocation3 + $0x1] sm:$0x1] %v50_v21  ;;  %v59_v22 = vld [vmem:[%s58_s30] sm:$0x1]  ;;  %s85_s6 = scalar_lea.vmem [#allocation7], %s235_s25  ;;  %s94_s7 = scalar_lea.vmem [#allocation7], %s237_s26 }
  0x3d   :  { %v68_v23 = vld [vmem:[%s67_s4] sm:$0x1]  ;;  %60 = vst [vmem:[#allocation3 + $0x2] sm:$0x1] %v59_v22  ;;  %s103_s8 = scalar_lea.vmem [#allocation7], %s239_s27 }
  0x3e   :  { %69 = vst [vmem:[#allocation3 + $0x3] sm:$0x1] %v68_v23  ;;  %v77_v24 = vld [vmem:[%s76_s5] sm:$0x1] }
  0x3f   :  { %v86_v25 = vld [vmem:[%s85_s6] sm:$0x1]  ;;  %78 = vst [vmem:[#allocation3 + $0x4] sm:$0x1] %v77_v24 }
  0x40   :  { %87 = vst [vmem:[#allocation3 + $0x5] sm:$0x1] %v86_v25  ;;  %v95_v26 = vld [vmem:[%s94_s7] sm:$0x1] }
  0x41   :  { %v106_v16 = vld [vmem:[#allocation2] sm:$0xff]  ;;  %96 = vst [vmem:[#allocation3 + $0x6] sm:$0x1] %v95_v26 }
  0x42   :  { %254 = vmatmul.mubr.f32.vlgmr.msra.gmra.mrb[0].mxu0 %v106_v16  ;;  %v104_v27 = vld [vmem:[%s103_s8] sm:$0x1] }
  0x43   :  { %105 = vst [vmem:[#allocation3 + $0x7] sm:$0x1] %v104_v27 }
  0x4a   :  { %v107_v28 = vld [vmem:[#allocation3] sm:$0xff] }
  0x4b   :  { %v108_v29 = vmul.f32 %v107_v28, %v106_v16 }
  0x4d   :  { %109 = vadd.xlane.f32.xlu1 %v108_v29 }
  0xda   :  { %v110_v41 = vpop.xlane.xlu1 %109 }
 0x115   :  { %v181_v17 = vpop.f32.mrb[0].mxu0 }
 0x116   :  { %v255_v18 = vpop.f32.mrb[1].mxu0  ;;  %v186_v19 = vsel %vm185_vm1, %v181_v17, -inf }
 0x117   :  { %187 = vmax.xlane.f32.xlu0 %v186_v19 }
 0x1a4   :  { %v188_v30 = vpop.xlane.xlu0 %187 }
 0x1a5   :  { %v189_v31 = vsub.f32 %v181_v17, %v188_v30 }
 0x1a7   :  { %v190_v32 = vmul.f32 1.442695, %v189_v31 }
 0x1a9   :  { %270 = vpow2.f32 %v190_v32 }
 0x1b3   :  { %v271_v33 = vpop.eup %270 }
 0x1b4   :  { %v192_v34 = vsel %vm185_vm1, %v271_v33, 0.0 }
 0x1b5   :  { %193 = vadd.xlane.f32.xlu0 %v192_v34 }
 0x242   :  { %v194_v35 = vpop.xlane.xlu0 %193 }
 0x243   :  { %272 = vlog2.f32 %v194_v35 }
 0x24d   :  { %v273_v38 = vpop.eup %272 }
 0x24e   :  { %v196_v39 = vmul.f32 0.6931472, %v273_v38 }
 0x250   :  { %v197_v40 = vadd.f32 %v196_v39, %v188_v30 }
 0x252   :  { %v202_v42 = vsel %vm201_vm2, %v197_v40, 0.0 }
 0x253   :  { %v203_v43 = vsel %vm200_vm3, %v110_v41, %v202_v42 }
 0x254   :  { %204 = vst [vmem:[%s380_s3] sm:$0xff] %v203_v43 }
 0x255   :  { %209 = vsyncpa [#allocation8], 1 }

</bundles_post_ra>
